<compile_context>
chip_gen: v6e
topology: v6e:2x2x1
jax: 0.10.0
libtpu: 0.0.40
codegen_flags: <defaults>
</compile_context>

<pallas_src>
import functools

import jax
import jax.numpy as jnp
from jax.experimental import pallas as pl
from jax.experimental.pallas import tpu as pltpu

_LANE = 128                       # TPU vreg lane width
_VMEM_BUDGET = 24 * 1024 * 1024   # per-step working-set target (all generations)


def _spectral_mul_kernel(xr_ref, xi_ref, wr_ref, wi_ref, or_ref, oi_ref):
    """Complex contraction out[b, o, m] = sum_i x[b, i, m] * w[i, o, m].

    xr/xi : (Bt, Cin, Mp)    retained Fourier modes of the input (real / imag)
    wr/wi : (Cin, Cout, Mp)  spectral weights for this region (real / imag)
    or/oi : (Bt, Cout, Mp)
    """
    bt, cin, mp = xr_ref.shape
    cout = wr_ref.shape[1]

    acc_r = jnp.zeros((bt, cout, mp), jnp.float32)
    acc_i = jnp.zeros((bt, cout, mp), jnp.float32)
    # Unrolled accumulate over Cin: only the two (Bt, Cout, Mp) accumulators
    # stay live instead of four (Cin, Cout, Mp) broadcast temporaries.
    # TODO(synk): for production FNO widths (Cin/Cout >= 32) restructure as a
    # per-mode batched dot_general so the FMAs land on the MXU instead of VPU.
    for i in range(cin):
        xr_i = xr_ref[:, i, :][:, None, :]        # (Bt, 1, Mp)
        xi_i = xi_ref[:, i, :][:, None, :]
        wr_i = wr_ref[i, :, :][None, :, :]        # (1, Cout, Mp)
        wi_i = wi_ref[i, :, :][None, :, :]
        acc_r = acc_r + (xr_i * wr_i - xi_i * wi_i)
        acc_i = acc_i + (xr_i * wi_i + xi_i * wr_i)

    or_ref[...] = acc_r
    oi_ref[...] = acc_i


def _pick_batch_tile(B, Cin, Cout, Mp):
    """Largest batch tile (dividing B) whose double-buffered footprint fits."""
    def footprint(bt):
        x_b = 2 * 2 * bt * Cin * Mp * 4      # real+imag planes, 2 pipeline bufs
        w_b = 2 * 2 * Cin * Cout * Mp * 4    # weights (block constant over b,
                                             # so never re-DMA'd within a region)
        o_b = 2 * 2 * bt * Cout * Mp * 4
        return x_b + w_b + o_b

    for bt in range(B, 0, -1):
        if B % bt == 0 and footprint(bt) <= _VMEM_BUDGET:
            return bt
    return 1


def spectral_mode_mul(xr, xi, wr, wi):
    """Pallas complex contraction over the retained Fourier modes.

    xr, xi : (R, B, Cin, Mp) float32   (R = 2 corner-mode regions)
    wr, wi : (R, Cin, Cout, Mp) float32
    returns (out_r, out_i) : (R, B, Cout, Mp) float32
    """
    R, B, Cin, Mp = xr.shape
    Cout = wr.shape[2]
    Bt = _pick_batch_tile(B, Cin, Cout, Mp)
    grid = (R, B // Bt)

    x_spec = pl.BlockSpec((None, Bt, Cin, Mp), lambda r, b: (r, b, 0, 0))
    # Weight block index is constant across the inner (batch) grid axis, so
    # Pallas DMAs it once per region.  (pipeline_mode=pl.Buffered(1) would
    # additionally drop the second buffer; left at default for portability.)
    w_spec = pl.BlockSpec((None, Cin, Cout, Mp), lambda r, b: (r, 0, 0, 0))
    o_spec = pl.BlockSpec((None, Bt, Cout, Mp), lambda r, b: (r, b, 0, 0))

    out_shape = (
        jax.ShapeDtypeStruct((R, B, Cout, Mp), jnp.float32),
        jax.ShapeDtypeStruct((R, B, Cout, Mp), jnp.float32),
    )

    return pl.pallas_call(
        _spectral_mul_kernel,
        out_shape=out_shape,
        grid=grid,
        in_specs=[x_spec, x_spec, w_spec, w_spec],
        out_specs=(o_spec, o_spec),
        compiler_params=pltpu.CompilerParams(
            # R = 2 regions shard across v7x's two TensorCores.
            dimension_semantics=("parallel", "parallel"),
            # Above v5e's 16 MiB scoped default, well within every
            # generation's physical VMEM (64-128 MiB).
            vmem_limit_bytes=32 * 1024 * 1024,
        ),
    )(xr, xi, wr, wi)


def spectral_conv2d(x, w1, w2, modes1, modes2):
    """Forward pass of SpectralConv2d.

    x      : (B, Cin, H, W) float32
    w1, w2 : (Cin, Cout, modes1, modes2) complex64
    returns (B, Cout, H, W) float32
    """
    B, Cin, H, W = x.shape
    Cout = w1.shape[1]
    m1, m2 = modes1, modes2
    Wh = W // 2 + 1
    M = m1 * m2
    Mp = ((M + _LANE - 1) // _LANE) * _LANE   # lane-dense padded mode count

    # FFT (glue, no Pallas equivalent)
    x_ft = jnp.fft.rfft2(x)                                  # (B, Cin, H, Wh) c64

    # gather the two retained corner-mode blocks, flatten modes -> lane axis,
    # and zero-pad the lane axis to a multiple of 128
    top = x_ft[:, :, :m1, :m2]
    bot = x_ft[:, :, H - m1:, :m2]
    x_modes = jnp.stack([top, bot], axis=0).reshape(2, B, Cin, M)
    x_modes = jnp.pad(x_modes, ((0, 0), (0, 0), (0, 0), (0, Mp - M)))
    xr = jnp.real(x_modes).astype(jnp.float32)
    xi = jnp.imag(x_modes).astype(jnp.float32)

    w = jnp.stack([w1, w2], axis=0).reshape(2, Cin, Cout, M)
    w = jnp.pad(w, ((0, 0), (0, 0), (0, 0), (0, Mp - M)))
    wr = jnp.real(w).astype(jnp.float32)
    wi = jnp.imag(w).astype(jnp.float32)

    out_r, out_i = spectral_mode_mul(xr, xi, wr, wi)         # (2, B, Cout, Mp)
    out_modes = (out_r[..., :M] + 1j * out_i[..., :M]).astype(jnp.complex64)
    out_modes = out_modes.reshape(2, B, Cout, m1, m2)

    # Assemble the full spectrum by concatenation (single HBM write) instead
    # of zeros().at[].set() which writes the whole spectrum twice.
    if 2 * m1 <= H:
        mid = jnp.zeros((B, Cout, H - 2 * m1, m2), jnp.complex64)
        left = jnp.concatenate([out_modes[0], mid, out_modes[1]], axis=2)
        right = jnp.zeros((B, Cout, H, Wh - m2), jnp.complex64)
        out_ft = jnp.concatenate([left, right], axis=3)
    else:
        # overlapping mode blocks: second scatter wins (identical to PyTorch)
        out_ft = jnp.zeros((B, Cout, H, Wh), dtype=jnp.complex64)
        out_ft = out_ft.at[:, :, :m1, :m2].set(out_modes[0])
        out_ft = out_ft.at[:, :, H - m1:, :m2].set(out_modes[1])

    # inverse FFT (glue)
    return jnp.fft.irfft2(out_ft, s=(H, W)).astype(jnp.float32)


def _reference(x, w1, w2, modes1, modes2):
    """Pure-JAX reference mirroring the PyTorch forward."""
    B, Cin, H, W = x.shape
    Cout = w1.shape[1]
    x_ft = jnp.fft.rfft2(x)
    out_ft = jnp.zeros((B, Cout, H, W // 2 + 1), dtype=jnp.complex64)
    out_ft = out_ft.at[:, :, :modes1, :modes2].set(
        jnp.einsum("bixy,ioxy->boxy", x_ft[:, :, :modes1, :modes2], w1)
    )
    out_ft = out_ft.at[:, :, H - modes1:, :modes2].set(
        jnp.einsum("bixy,ioxy->boxy", x_ft[:, :, H - modes1:, :modes2], w2)
    )
    return jnp.fft.irfft2(out_ft, s=(H, W)).astype(jnp.float32)


if __name__ == "__main__":
    # small shapes consistent with the module
    B, Cin, Cout = 2, 4, 4
    H = W = 16
    modes1 = modes2 = 4

    key = jax.random.PRNGKey(0)
    kx, kw1r, kw1i, kw2r, kw2i = jax.random.split(key, 5)

    x = jax.random.normal(kx, (B, Cin, H, W), dtype=jnp.float32)

    # deterministic parameter init mirroring:
    #   scale * torch.rand(in, out, m1, m2, dtype=cfloat)
    scale = 1.0 / (Cin * Cout)
    shape_w = (Cin, Cout, modes1, modes2)
    w1 = (scale * jax.random.uniform(kw1r, shape_w)
          + 1j * scale * jax.random.uniform(kw1i, shape_w)).astype(jnp.complex64)
    w2 = (scale * jax.random.uniform(kw2r, shape_w)
          + 1j * scale * jax.random.uniform(kw2i, shape_w)).astype(jnp.complex64)

    fwd = jax.jit(functools.partial(spectral_conv2d, modes1=modes1, modes2=modes2))
    out = jax.block_until_ready(fwd(x, w1, w2))

    ref = jax.block_until_ready(_reference(x, w1, w2, modes1, modes2))
    assert out.shape == (B, Cout, H, W)
    assert jnp.allclose(out, ref, atol=1e-4, rtol=1e-4), "mismatch vs reference"

    print("KERNEL_OK")
</pallas_src>

<mosaic_0001>
module attributes {stable_mosaic.version = 11 : i64} {
  func.func @_spectral_mul_kernel(%arg0: i32, %arg1: i32, %arg2: memref<1x2x4x128xf32, #tpu.memory_space<vmem>>, %arg3: memref<1x2x4x128xf32, #tpu.memory_space<vmem>>, %arg4: memref<1x4x4x128xf32, #tpu.memory_space<vmem>>, %arg5: memref<1x4x4x128xf32, #tpu.memory_space<vmem>>, %arg6: memref<1x2x4x128xf32, #tpu.memory_space<vmem>>, %arg7: memref<1x2x4x128xf32, #tpu.memory_space<vmem>>) attributes {dimension_semantics = [#tpu.dimension_semantics<parallel>, #tpu.dimension_semantics<parallel>], iteration_bounds = array<i64: 2, 1>, scalar_prefetch = 0 : i64, scratch_operands = 0 : i64, tpu.core_type = #tpu.core_type<tc>, window_params = [{transform_indices = @transform_0, window_bounds = array<i64: 1, 2, 4, 128>}, {transform_indices = @transform_1, window_bounds = array<i64: 1, 2, 4, 128>}, {transform_indices = @transform_2, window_bounds = array<i64: 1, 4, 4, 128>}, {transform_indices = @transform_3, window_bounds = array<i64: 1, 4, 4, 128>}, {transform_indices = @transform_4, window_bounds = array<i64: 1, 2, 4, 128>}, {transform_indices = @transform_5, window_bounds = array<i64: 1, 2, 4, 128>}]} {
    %cst = arith.constant 0.000000e+00 : f32
    %0 = vector.broadcast %cst : f32 to vector<2x4x128xf32>
    %cst_0 = arith.constant 0.000000e+00 : f32
    %1 = vector.broadcast %cst_0 : f32 to vector<2x4x128xf32>
    %c0 = arith.constant 0 : index
    %c0_1 = arith.constant 0 : index
    %c0_2 = arith.constant 0 : index
    %c0_3 = arith.constant 0 : index
    %2 = vector.load %arg2[%c0, %c0_1, %c0_2, %c0_3] : memref<1x2x4x128xf32, #tpu.memory_space<vmem>>, vector<1x2x1x128xf32>
    %3 = vector.shape_cast %2 : vector<1x2x1x128xf32> to vector<2x128xf32>
    %4 = vector.shape_cast %3 : vector<2x128xf32> to vector<2x1x128xf32>
    %c0_4 = arith.constant 0 : index
    %c0_5 = arith.constant 0 : index
    %c0_6 = arith.constant 0 : index
    %c0_7 = arith.constant 0 : index
    %5 = vector.load %arg3[%c0_4, %c0_5, %c0_6, %c0_7] : memref<1x2x4x128xf32, #tpu.memory_space<vmem>>, vector<1x2x1x128xf32>
    %6 = vector.shape_cast %5 : vector<1x2x1x128xf32> to vector<2x128xf32>
    %7 = vector.shape_cast %6 : vector<2x128xf32> to vector<2x1x128xf32>
    %c0_8 = arith.constant 0 : index
    %c0_9 = arith.constant 0 : index
    %c0_10 = arith.constant 0 : index
    %c0_11 = arith.constant 0 : index
    %8 = vector.load %arg4[%c0_8, %c0_9, %c0_10, %c0_11] : memref<1x4x4x128xf32, #tpu.memory_space<vmem>>, vector<1x1x4x128xf32>
    %9 = vector.shape_cast %8 : vector<1x1x4x128xf32> to vector<4x128xf32>
    %10 = vector.shape_cast %9 : vector<4x128xf32> to vector<1x4x128xf32>
    %c0_12 = arith.constant 0 : index
    %c0_13 = arith.constant 0 : index
    %c0_14 = arith.constant 0 : index
    %c0_15 = arith.constant 0 : index
    %11 = vector.load %arg5[%c0_12, %c0_13, %c0_14, %c0_15] : memref<1x4x4x128xf32, #tpu.memory_space<vmem>>, vector<1x1x4x128xf32>
    %12 = vector.shape_cast %11 : vector<1x1x4x128xf32> to vector<4x128xf32>
    %13 = vector.shape_cast %12 : vector<4x128xf32> to vector<1x4x128xf32>
    %14 = vector.broadcast %4 : vector<2x1x128xf32> to vector<2x4x128xf32>
    %15 = vector.broadcast %10 : vector<1x4x128xf32> to vector<2x4x128xf32>
    %16 = arith.mulf %14, %15 : vector<2x4x128xf32>
    %17 = vector.broadcast %7 : vector<2x1x128xf32> to vector<2x4x128xf32>
    %18 = vector.broadcast %13 : vector<1x4x128xf32> to vector<2x4x128xf32>
    %19 = arith.mulf %17, %18 : vector<2x4x128xf32>
    %20 = arith.subf %16, %19 : vector<2x4x128xf32>
    %21 = arith.addf %0, %20 : vector<2x4x128xf32>
    %22 = vector.broadcast %4 : vector<2x1x128xf32> to vector<2x4x128xf32>
    %23 = vector.broadcast %13 : vector<1x4x128xf32> to vector<2x4x128xf32>
    %24 = arith.mulf %22, %23 : vector<2x4x128xf32>
    %25 = vector.broadcast %7 : vector<2x1x128xf32> to vector<2x4x128xf32>
    %26 = vector.broadcast %10 : vector<1x4x128xf32> to vector<2x4x128xf32>
    %27 = arith.mulf %25, %26 : vector<2x4x128xf32>
    %28 = arith.addf %24, %27 : vector<2x4x128xf32>
    %29 = arith.addf %1, %28 : vector<2x4x128xf32>
    %c0_16 = arith.constant 0 : index
    %c0_17 = arith.constant 0 : index
    %c1 = arith.constant 1 : index
    %c0_18 = arith.constant 0 : index
    %30 = vector.load %arg2[%c0_16, %c0_17, %c1, %c0_18] : memref<1x2x4x128xf32, #tpu.memory_space<vmem>>, vector<1x2x1x128xf32>
    %31 = vector.shape_cast %30 : vector<1x2x1x128xf32> to vector<2x128xf32>
    %32 = vector.shape_cast %31 : vector<2x128xf32> to vector<2x1x128xf32>
    %c0_19 = arith.constant 0 : index
    %c0_20 = arith.constant 0 : index
    %c1_21 = arith.constant 1 : index
    %c0_22 = arith.constant 0 : index
    %33 = vector.load %arg3[%c0_19, %c0_20, %c1_21, %c0_22] : memref<1x2x4x128xf32, #tpu.memory_space<vmem>>, vector<1x2x1x128xf32>
    %34 = vector.shape_cast %33 : vector<1x2x1x128xf32> to vector<2x128xf32>
    %35 = vector.shape_cast %34 : vector<2x128xf32> to vector<2x1x128xf32>
    %c0_23 = arith.constant 0 : index
    %c1_24 = arith.constant 1 : index
    %c0_25 = arith.constant 0 : index
    %c0_26 = arith.constant 0 : index
    %36 = vector.load %arg4[%c0_23, %c1_24, %c0_25, %c0_26] : memref<1x4x4x128xf32, #tpu.memory_space<vmem>>, vector<1x1x4x128xf32>
    %37 = vector.shape_cast %36 : vector<1x1x4x128xf32> to vector<4x128xf32>
    %38 = vector.shape_cast %37 : vector<4x128xf32> to vector<1x4x128xf32>
    %c0_27 = arith.constant 0 : index
    %c1_28 = arith.constant 1 : index
    %c0_29 = arith.constant 0 : index
    %c0_30 = arith.constant 0 : index
    %39 = vector.load %arg5[%c0_27, %c1_28, %c0_29, %c0_30] : memref<1x4x4x128xf32, #tpu.memory_space<vmem>>, vector<1x1x4x128xf32>
    %40 = vector.shape_cast %39 : vector<1x1x4x128xf32> to vector<4x128xf32>
    %41 = vector.shape_cast %40 : vector<4x128xf32> to vector<1x4x128xf32>
    %42 = vector.broadcast %32 : vector<2x1x128xf32> to vector<2x4x128xf32>
    %43 = vector.broadcast %38 : vector<1x4x128xf32> to vector<2x4x128xf32>
    %44 = arith.mulf %42, %43 : vector<2x4x128xf32>
    %45 = vector.broadcast %35 : vector<2x1x128xf32> to vector<2x4x128xf32>
    %46 = vector.broadcast %41 : vector<1x4x128xf32> to vector<2x4x128xf32>
    %47 = arith.mulf %45, %46 : vector<2x4x128xf32>
    %48 = arith.subf %44, %47 : vector<2x4x128xf32>
    %49 = arith.addf %21, %48 : vector<2x4x128xf32>
    %50 = vector.broadcast %32 : vector<2x1x128xf32> to vector<2x4x128xf32>
    %51 = vector.broadcast %41 : vector<1x4x128xf32> to vector<2x4x128xf32>
    %52 = arith.mulf %50, %51 : vector<2x4x128xf32>
    %53 = vector.broadcast %35 : vector<2x1x128xf32> to vector<2x4x128xf32>
    %54 = vector.broadcast %38 : vector<1x4x128xf32> to vector<2x4x128xf32>
    %55 = arith.mulf %53, %54 : vector<2x4x128xf32>
    %56 = arith.addf %52, %55 : vector<2x4x128xf32>
    %57 = arith.addf %29, %56 : vector<2x4x128xf32>
    %c0_31 = arith.constant 0 : index
    %c0_32 = arith.constant 0 : index
    %c2 = arith.constant 2 : index
    %c0_33 = arith.constant 0 : index
    %58 = vector.load %arg2[%c0_31, %c0_32, %c2, %c0_33] : memref<1x2x4x128xf32, #tpu.memory_space<vmem>>, vector<1x2x1x128xf32>
    %59 = vector.shape_cast %58 : vector<1x2x1x128xf32> to vector<2x128xf32>
    %60 = vector.shape_cast %59 : vector<2x128xf32> to vector<2x1x128xf32>
    %c0_34 = arith.constant 0 : index
    %c0_35 = arith.constant 0 : index
    %c2_36 = arith.constant 2 : index
    %c0_37 = arith.constant 0 : index
    %61 = vector.load %arg3[%c0_34, %c0_35, %c2_36, %c0_37] : memref<1x2x4x128xf32, #tpu.memory_space<vmem>>, vector<1x2x1x128xf32>
    %62 = vector.shape_cast %61 : vector<1x2x1x128xf32> to vector<2x128xf32>
    %63 = vector.shape_cast %62 : vector<2x128xf32> to vector<2x1x128xf32>
    %c0_38 = arith.constant 0 : index
    %c2_39 = arith.constant 2 : index
    %c0_40 = arith.constant 0 : index
    %c0_41 = arith.constant 0 : index
    %64 = vector.load %arg4[%c0_38, %c2_39, %c0_40, %c0_41] : memref<1x4x4x128xf32, #tpu.memory_space<vmem>>, vector<1x1x4x128xf32>
    %65 = vector.shape_cast %64 : vector<1x1x4x128xf32> to vector<4x128xf32>
    %66 = vector.shape_cast %65 : vector<4x128xf32> to vector<1x4x128xf32>
    %c0_42 = arith.constant 0 : index
    %c2_43 = arith.constant 2 : index
    %c0_44 = arith.constant 0 : index
    %c0_45 = arith.constant 0 : index
    %67 = vector.load %arg5[%c0_42, %c2_43, %c0_44, %c0_45] : memref<1x4x4x128xf32, #tpu.memory_space<vmem>>, vector<1x1x4x128xf32>
    %68 = vector.shape_cast %67 : vector<1x1x4x128xf32> to vector<4x128xf32>
    %69 = vector.shape_cast %68 : vector<4x128xf32> to vector<1x4x128xf32>
    %70 = vector.broadcast %60 : vector<2x1x128xf32> to vector<2x4x128xf32>
    %71 = vector.broadcast %66 : vector<1x4x128xf32> to vector<2x4x128xf32>
    %72 = arith.mulf %70, %71 : vector<2x4x128xf32>
    %73 = vector.broadcast %63 : vector<2x1x128xf32> to vector<2x4x128xf32>
    %74 = vector.broadcast %69 : vector<1x4x128xf32> to vector<2x4x128xf32>
    %75 = arith.mulf %73, %74 : vector<2x4x128xf32>
    %76 = arith.subf %72, %75 : vector<2x4x128xf32>
    %77 = arith.addf %49, %76 : vector<2x4x128xf32>
    %78 = vector.broadcast %60 : vector<2x1x128xf32> to vector<2x4x128xf32>
    %79 = vector.broadcast %69 : vector<1x4x128xf32> to vector<2x4x128xf32>
    %80 = arith.mulf %78, %79 : vector<2x4x128xf32>
    %81 = vector.broadcast %63 : vector<2x1x128xf32> to vector<2x4x128xf32>
    %82 = vector.broadcast %66 : vector<1x4x128xf32> to vector<2x4x128xf32>
    %83 = arith.mulf %81, %82 : vector<2x4x128xf32>
    %84 = arith.addf %80, %83 : vector<2x4x128xf32>
    %85 = arith.addf %57, %84 : vector<2x4x128xf32>
    %c0_46 = arith.constant 0 : index
    %c0_47 = arith.constant 0 : index
    %c3 = arith.constant 3 : index
    %c0_48 = arith.constant 0 : index
    %86 = vector.load %arg2[%c0_46, %c0_47, %c3, %c0_48] : memref<1x2x4x128xf32, #tpu.memory_space<vmem>>, vector<1x2x1x128xf32>
    %87 = vector.shape_cast %86 : vector<1x2x1x128xf32> to vector<2x128xf32>
    %88 = vector.shape_cast %87 : vector<2x128xf32> to vector<2x1x128xf32>
    %c0_49 = arith.constant 0 : index
    %c0_50 = arith.constant 0 : index
    %c3_51 = arith.constant 3 : index
    %c0_52 = arith.constant 0 : index
    %89 = vector.load %arg3[%c0_49, %c0_50, %c3_51, %c0_52] : memref<1x2x4x128xf32, #tpu.memory_space<vmem>>, vector<1x2x1x128xf32>
    %90 = vector.shape_cast %89 : vector<1x2x1x128xf32> to vector<2x128xf32>
    %91 = vector.shape_cast %90 : vector<2x128xf32> to vector<2x1x128xf32>
    %c0_53 = arith.constant 0 : index
    %c3_54 = arith.constant 3 : index
    %c0_55 = arith.constant 0 : index
    %c0_56 = arith.constant 0 : index
    %92 = vector.load %arg4[%c0_53, %c3_54, %c0_55, %c0_56] : memref<1x4x4x128xf32, #tpu.memory_space<vmem>>, vector<1x1x4x128xf32>
    %93 = vector.shape_cast %92 : vector<1x1x4x128xf32> to vector<4x128xf32>
    %94 = vector.shape_cast %93 : vector<4x128xf32> to vector<1x4x128xf32>
    %c0_57 = arith.constant 0 : index
    %c3_58 = arith.constant 3 : index
    %c0_59 = arith.constant 0 : index
    %c0_60 = arith.constant 0 : index
    %95 = vector.load %arg5[%c0_57, %c3_58, %c0_59, %c0_60] : memref<1x4x4x128xf32, #tpu.memory_space<vmem>>, vector<1x1x4x128xf32>
    %96 = vector.shape_cast %95 : vector<1x1x4x128xf32> to vector<4x128xf32>
    %97 = vector.shape_cast %96 : vector<4x128xf32> to vector<1x4x128xf32>
    %98 = vector.broadcast %88 : vector<2x1x128xf32> to vector<2x4x128xf32>
    %99 = vector.broadcast %94 : vector<1x4x128xf32> to vector<2x4x128xf32>
    %100 = arith.mulf %98, %99 : vector<2x4x128xf32>
    %101 = vector.broadcast %91 : vector<2x1x128xf32> to vector<2x4x128xf32>
    %102 = vector.broadcast %97 : vector<1x4x128xf32> to vector<2x4x128xf32>
    %103 = arith.mulf %101, %102 : vector<2x4x128xf32>
    %104 = arith.subf %100, %103 : vector<2x4x128xf32>
    %105 = arith.addf %77, %104 : vector<2x4x128xf32>
    %106 = vector.broadcast %88 : vector<2x1x128xf32> to vector<2x4x128xf32>
    %107 = vector.broadcast %97 : vector<1x4x128xf32> to vector<2x4x128xf32>
    %108 = arith.mulf %106, %107 : vector<2x4x128xf32>
    %109 = vector.broadcast %91 : vector<2x1x128xf32> to vector<2x4x128xf32>
    %110 = vector.broadcast %94 : vector<1x4x128xf32> to vector<2x4x128xf32>
    %111 = arith.mulf %109, %110 : vector<2x4x128xf32>
    %112 = arith.addf %108, %111 : vector<2x4x128xf32>
    %113 = arith.addf %85, %112 : vector<2x4x128xf32>
    %c0_61 = arith.constant 0 : index
    %c0_62 = arith.constant 0 : index
    %c0_63 = arith.constant 0 : index
    %c0_64 = arith.constant 0 : index
    %114 = vector.load %arg6[%c0_61, %c0_62, %c0_63, %c0_64] : memref<1x2x4x128xf32, #tpu.memory_space<vmem>>, vector<1x2x4x128xf32>
    %115 = vector.shape_cast %114 : vector<1x2x4x128xf32> to vector<2x4x128xf32>
    %116 = vector.shape_cast %105 : vector<2x4x128xf32> to vector<1x2x4x128xf32>
    tpu.vector_store %arg6[%c0_61, %c0_62, %c0_63, %c0_64], %116 {strides = array<i32>} : memref<1x2x4x128xf32, #tpu.memory_space<vmem>>, vector<1x2x4x128xf32>,
    %c0_65 = arith.constant 0 : index
    %c0_66 = arith.constant 0 : index
    %c0_67 = arith.constant 0 : index
    %c0_68 = arith.constant 0 : index
    %117 = vector.load %arg7[%c0_65, %c0_66, %c0_67, %c0_68] : memref<1x2x4x128xf32, #tpu.memory_space<vmem>>, vector<1x2x4x128xf32>
    %118 = vector.shape_cast %117 : vector<1x2x4x128xf32> to vector<2x4x128xf32>
    %119 = vector.shape_cast %113 : vector<2x4x128xf32> to vector<1x2x4x128xf32>
    tpu.vector_store %arg7[%c0_65, %c0_66, %c0_67, %c0_68], %119 {strides = array<i32>} : memref<1x2x4x128xf32, #tpu.memory_space<vmem>>, vector<1x2x4x128xf32>,
    return
  }
  func.func @transform_0(%arg0: i32, %arg1: i32) -> (i32, i32, i32, i32) {
    %c0_i32 = arith.constant 0 : i32
    %c0_i32_0 = arith.constant 0 : i32
    %c0_i32_1 = arith.constant 0 : i32
    return %arg0, %arg1, %c0_i32, %c0_i32_0 : i32, i32, i32, i32
  }
  func.func @transform_1(%arg0: i32, %arg1: i32) -> (i32, i32, i32, i32) {
    %c0_i32 = arith.constant 0 : i32
    %c0_i32_0 = arith.constant 0 : i32
    %c0_i32_1 = arith.constant 0 : i32
    return %arg0, %arg1, %c0_i32, %c0_i32_0 : i32, i32, i32, i32
  }
  func.func @transform_2(%arg0: i32, %arg1: i32) -> (i32, i32, i32, i32) {
    %c0_i32 = arith.constant 0 : i32
    %c0_i32_0 = arith.constant 0 : i32
    %c0_i32_1 = arith.constant 0 : i32
    %c0_i32_2 = arith.constant 0 : i32
    return %arg0, %c0_i32, %c0_i32_0, %c0_i32_1 : i32, i32, i32, i32
  }
  func.func @transform_3(%arg0: i32, %arg1: i32) -> (i32, i32, i32, i32) {
    %c0_i32 = arith.constant 0 : i32
    %c0_i32_0 = arith.constant 0 : i32
    %c0_i32_1 = arith.constant 0 : i32
    %c0_i32_2 = arith.constant 0 : i32
    return %arg0, %c0_i32, %c0_i32_0, %c0_i32_1 : i32, i32, i32, i32
  }
  func.func @transform_4(%arg0: i32, %arg1: i32) -> (i32, i32, i32, i32) {
    %c0_i32 = arith.constant 0 : i32
    %c0_i32_0 = arith.constant 0 : i32
    %c0_i32_1 = arith.constant 0 : i32
    return %arg0, %arg1, %c0_i32, %c0_i32_0 : i32, i32, i32, i32
  }
  func.func @transform_5(%arg0: i32, %arg1: i32) -> (i32, i32, i32, i32) {
    %c0_i32 = arith.constant 0 : i32
    %c0_i32_0 = arith.constant 0 : i32
    %c0_i32_1 = arith.constant 0 : i32
    return %arg0, %arg1, %c0_i32, %c0_i32_0 : i32, i32, i32, i32
  }
}

</mosaic_0001>

<bundles_post_ra>
// kernel: custom-call
= control target key start
LH: loop header
LB: loop body
LE: loop exit
PB: predicated region body
PF: predicated region fallthrough
CT: control target
= control target key end

     0   :  { %2 = vsyncpa [#allocation0], 0  ;;  %s47_s0 = inlined_call_operand.hbm [shape: c64[4,4,4,4], index: 0, kind: input, shape index: {}]   ;;  %s48_s1 = inlined_call_operand.vmem [shape: f32[4,4,4,4], index: 1, kind: output, shape index: {}]  }
   0x1   :  { %s3_s8 = sshll.u32 %s48_s1, 4  ;;  %s4_s8 = int_to_ptr.vmem [resolvable:$true] %s3_s8 }
   0x2   :  { %s17_s9 = scalar_lea.vmem %s4_s8, 1024  ;;  %p22_p1 = scmp.lt.s32.totalorder %s4_s8, %s4_s8 }
   0x3   :  { %p18_p0 = scmp.ne.s32.totalorder %s4_s8, %s17_s9  ;;  %p23_p2 = scmp.lt.s32.totalorder %s17_s9, %s17_s9 }
   0x5   :  { %p24_p3 = por %p23_p2, %p22_p1 }
   0x7   :  { %p25_p4 = pnand %p24_p3, %p18_p0 }
   0x9   :  { %28 = shalt.err (!%p25_p4)  }
   0xa   :  { %6 = dma.hbm_to_vmem [thread:$0]  %s47_s0, 1024, %s4_s8, [#allocation0] }
   0xb   :  { %29 = dma.done.wait [#allocation0], 1024  }
   0xc   :  { %30 = vsyncadd [#allocation0], 4294966272 }
   0xd   :  { %8 = vsyncpa [#allocation0], 1 }

// kernel: custom-call.1
= control target key start
LH: loop header
LB: loop body
LE: loop exit
PB: predicated region body
PF: predicated region fallthrough
CT: control target
= control target key end

     0   :  { %s51_s0 = inlined_call_operand.hbm [shape: c64[4,4,4,4], index: 0, kind: input, shape index: {}]   ;;  %s52_s1 = inlined_call_operand.vmem [shape: f32[4,4,4,4], index: 1, kind: output, shape index: {}]  }
   0x1   :  { %s2_s8 = scalar_lea.hbm %s51_s0, 1024 }
   0x2   :  { %3 = vsyncpa [#allocation0], 0  ;;  %s4_s11 = sshll.u32 %s52_s1, 4  ;;  %s5_s11 = int_to_ptr.vmem [resolvable:$true] %s4_s11 }
   0x3   :  { %s20_s12 = scalar_lea.vmem %s5_s11, 1024  ;;  %p25_p1 = scmp.lt.s32.totalorder %s5_s11, %s5_s11 }
   0x4   :  { %p21_p0 = scmp.ne.s32.totalorder %s5_s11, %s20_s12  ;;  %p26_p2 = scmp.lt.s32.totalorder %s20_s12, %s20_s12 }
   0x6   :  { %p27_p3 = por %p26_p2, %p25_p1 }
   0x8   :  { %p28_p4 = pnand %p27_p3, %p21_p0 }
   0xa   :  { %31 = shalt.err (!%p28_p4)  }
   0xb   :  { %7 = dma.hbm_to_vmem [thread:$0]  %s2_s8, 1024, %s5_s11, [#allocation0] }
   0xc   :  { %33 = dma.done.wait [#allocation0], 1024  }
   0xd   :  { %34 = vsyncadd [#allocation0], 4294966272 }
   0xe   :  { %9 = vsyncpa [#allocation0], 1 }

// kernel: squeeze.2
= control target key start
LH: loop header
LB: loop body
LE: loop exit
PB: predicated region body
PF: predicated region fallthrough
CT: control target
= control target key end

     0   :  { %vm12_vm0 = vcmask 31744   ;;  %s117_s10 = smov 116   ;;  %s118_s11 = smov 120   ;;  %s167_s0 = inlined_call_operand.vmem [shape: f32[1,2,4,16], index: 0, kind: input, shape index: {}]   ;;  %s168_s1 = inlined_call_operand.vmem [shape: f32[2,4,4,4], index: 1, kind: output, shape index: {}]  }
   0x1   :  { %v105_v0 = vld [vmem:[%s167_s0 + $0x4] sm:$0xf]  ;;  %v9_v1 = vld [vmem:[%s167_s0] sm:$0xf]  ;;  %s116_s0 = smov 124  }
   0x2   :  { %8 = vst [vmem:[#allocation1 + $0x8] sm:$0xf] %v105_v0  ;;  %10 = vst [vmem:[#allocation1] sm:$0xf] %v9_v1 }
   0x9   :  { %v11_v2 = vld [vmem:[#allocation1] sm:$0xf]   ;;  %v15_v4 = vld [vmem:[#allocation1 + $0x8] sm:$0xf]  }
   0xa   :  { %v19_v3 = vld.sshfl [vmem:[#allocation1] sm:$0xff pattern:$0xba983210]   ;;  %13 = vst.msk [vmem:[#allocation0] ss:$8 sm:$0xf] %vm12_vm0, %v11_v2  }
   0xb   :  { %20 = vrot.lane.b32.xlu0 %v19_v3, %s116_s0  ;;  %36 = vrot.lane.b32.xlu1 %v19_v3, %s117_s10  ;;  %18 = vst.msk [vmem:[#allocation0 + $0x20] ss:$8 sm:$0xf] %vm12_vm0, %v15_v4  }
   0xf   :  { %28 = vrot.lane.b32.xlu0 %v19_v3, %s118_s11 }
  0x7d   :  { %v21_v5 = vpop.permute.xlu0 %20   ;;  %v37_v6 = vpop.permute.xlu1 %36  }
  0x7e   :  { %24 = vst.msk [vmem:[#allocation0 + $0x1] ss:$8 sm:$0xf] %vm12_vm0, %v21_v5   ;;  %26 = vst.msk [vmem:[#allocation0 + $0x1] ss:$8 sm:$0xf0] %vm12_vm0, %v21_v5  }
  0x7f   :  { %40 = vst.msk [vmem:[#allocation0 + $0x3] ss:$8 sm:$0xf] %vm12_vm0, %v37_v6   ;;  %42 = vst.msk [vmem:[#allocation0 + $0x3] ss:$8 sm:$0xf0] %vm12_vm0, %v37_v6  }
  0x81   :  { %v29_v7 = vpop.permute.xlu0 %28  }
  0x82   :  { %32 = vst.msk [vmem:[#allocation0 + $0x2] ss:$8 sm:$0xf] %vm12_vm0, %v29_v7   ;;  %34 = vst.msk [vmem:[#allocation0 + $0x2] ss:$8 sm:$0xf0] %vm12_vm0, %v29_v7  }
  0x89   :  { %v47_v8 = vld [vmem:[#allocation0] sm:$0xf]  ;;  %v52_v9 = vld [vmem:[#allocation0 + $0x8] sm:$0xf]  ;;  %v58_v10 = vld [vmem:[#allocation0 + $0x10] sm:$0xf] }
  0x8a   :  { %50 = vst [vmem:[%s168_s1] sm:$0xf] %v47_v8  ;;  %106 = vst [vmem:[%s168_s1 + $0x4] sm:$0xf] %v52_v9  ;;  %v65_v11 = vld [vmem:[#allocation0 + $0x18] sm:$0xf] }
  0x8b   :  { %107 = vst [vmem:[%s168_s1 + $0x8] sm:$0xf] %v58_v10  ;;  %v72_v12 = vld [vmem:[#allocation0 + $0x20] sm:$0xf]  ;;  %v79_v13 = vld [vmem:[#allocation0 + $0x28] sm:$0xf] }
  0x8c   :  { %108 = vst [vmem:[%s168_s1 + $0xc] sm:$0xf] %v65_v11  ;;  %109 = vst [vmem:[%s168_s1 + $0x10] sm:$0xf] %v72_v12  ;;  %v86_v14 = vld [vmem:[#allocation0 + $0x30] sm:$0xf] }
  0x8d   :  { %110 = vst [vmem:[%s168_s1 + $0x14] sm:$0xf] %v79_v13  ;;  %v93_v15 = vld [vmem:[#allocation0 + $0x38] sm:$0xf]  ;;  %111 = vst [vmem:[%s168_s1 + $0x18] sm:$0xf] %v86_v14 }
  0x8e   :  { %112 = vst [vmem:[%s168_s1 + $0x1c] sm:$0xf] %v93_v15 }

// kernel: reverse.0
= control target key start
LH: loop header
LB: loop body
LE: loop exit
PB: predicated region body
PF: predicated region fallthrough
CT: control target
= control target key end

     0   :  { %v72_v3 = vlaneseq  ;;  %v65_v9 = vld [vmem:[#allocation0 + $0x7] ss:$-1 sm:$0xff]  ;;  %v79_v12 = vld [vmem:[#allocation0 + $0x17] ss:$-1 sm:$0xff]  ;;  %s331_s0 = inlined_call_operand.vmem [shape: f32[2,4,16,7], index: 0, kind: input, shape index: {}]   ;;  %s332_s1 = inlined_call_operand.vmem [shape: f32[2,4,16,7], index: 1, kind: output, shape index: {}]  }
   0x1   :  { %v45_v0 = vld [vmem:[%s331_s0] sm:$0xff]  ;;  %v47_v1 = vld [vmem:[%s331_s0 + $0x8] sm:$0xff]  ;;  %v49_v2 = vld [vmem:[%s331_s0 + $0x10] sm:$0xff]  ;;  %v66_v10 = vrot.slane %v65_v9, 1  ;;  %v80_v14 = vrot.slane %v79_v12, 1 }
   0x2   :  { %46 = vst [vmem:[#allocation0 + $0x8] sm:$0xff] %v45_v0  ;;  %48 = vst [vmem:[#allocation0 + $0x18] sm:$0xff] %v47_v1  ;;  %v51_v4 = vld [vmem:[%s331_s0 + $0x18] sm:$0xff]  ;;  %v53_v5 = vld [vmem:[%s331_s0 + $0x20] sm:$0xff]  ;;  %v73_v11 = vshrl.u32 %v72_v3, 7 }
   0x3   :  { %50 = vst [vmem:[#allocation0 + $0x28] sm:$0xff] %v49_v2  ;;  %v55_v6 = vld [vmem:[%s331_s0 + $0x28] sm:$0xff]  ;;  %52 = vst [vmem:[#allocation0 + $0x38] sm:$0xff] %v51_v4  ;;  %v57_v7 = vld [vmem:[%s331_s0 + $0x30] sm:$0xff] }
   0x4   :  { %54 = vst [vmem:[#allocation0 + $0x48] sm:$0xff] %v53_v5  ;;  %56 = vst [vmem:[#allocation0 + $0x58] sm:$0xff] %v55_v6  ;;  %v59_v8 = vld [vmem:[%s331_s0 + $0x38] sm:$0xff]  ;;  %v93_v13 = vld [vmem:[#allocation0 + $0x27] ss:$-1 sm:$0xff]  ;;  %vm74_vm0 = vcmp.lt.s32.totalorder %v73_v11, 7 }
   0x5   :  { %58 = vst [vmem:[#allocation0 + $0x68] sm:$0xff] %v57_v7  ;;  %60 = vst [vmem:[#allocation0 + $0x78] sm:$0xff] %v59_v8  ;;  %v94_v15 = vrot.slane %v93_v13, 1  ;;  %v107_v16 = vld [vmem:[#allocation0 + $0x37] ss:$-1 sm:$0xff] }
   0x6   :  { %67 = vst [vmem:[#allocation1] sm:$0xff] %v66_v10  ;;  %v108_v17 = vrot.slane %v107_v16, 1  ;;  %v121_v18 = vld [vmem:[#allocation0 + $0x47] ss:$-1 sm:$0xff]  ;;  %v135_v19 = vld [vmem:[#allocation0 + $0x57] ss:$-1 sm:$0xff] }
   0x7   :  { %81 = vst [vmem:[#allocation1 + $0x8] sm:$0xff] %v80_v14  ;;  %95 = vst [vmem:[#allocation1 + $0x10] sm:$0xff] %v94_v15  ;;  %v122_v20 = vrot.slane %v121_v18, 1  ;;  %v136_v21 = vrot.slane %v135_v19, 1  ;;  %v149_v22 = vld [vmem:[#allocation0 + $0x67] ss:$-1 sm:$0xff] }
   0x8   :  { %v163_v23 = vld [vmem:[#allocation0 + $0x77] ss:$-1 sm:$0xff]  ;;  %109 = vst [vmem:[#allocation1 + $0x18] sm:$0xff] %v108_v17  ;;  %v150_v24 = vrot.slane %v149_v22, 1 }
   0x9   :  { %v164_v25 = vrot.slane %v163_v23, 1  ;;  %v70_v26 = vld [vmem:[#allocation0 + $0xf] ss:$-1 sm:$0xff]  ;;  %v84_v27 = vld [vmem:[#allocation0 + $0x1f] ss:$-1 sm:$0xff]  ;;  %123 = vst [vmem:[#allocation1 + $0x20] sm:$0xff] %v122_v20 }
   0xa   :  { %v98_v28 = vld [vmem:[#allocation0 + $0x2f] ss:$-1 sm:$0xff]  ;;  %137 = vst [vmem:[#allocation1 + $0x28] sm:$0xff] %v136_v21  ;;  %v71_v29 = vrot.slane %v70_v26, 1  ;;  %v85_v30 = vrot.slane %v84_v27, 1  ;;  %151 = vst [vmem:[#allocation1 + $0x30] sm:$0xff] %v150_v24 }
   0xb   :  { %v99_v31 = vrot.slane %v98_v28, 1  ;;  %v112_v32 = vld [vmem:[#allocation0 + $0x3f] ss:$-1 sm:$0xff]  ;;  %165 = vst [vmem:[#allocation1 + $0x38] sm:$0xff] %v164_v25  ;;  %v126_v34 = vld [vmem:[#allocation0 + $0x4f] ss:$-1 sm:$0xff] }
   0xc   :  { %v113_v33 = vrot.slane %v112_v32, 1  ;;  %v140_v35 = vld [vmem:[#allocation0 + $0x5f] ss:$-1 sm:$0xff]  ;;  %75 = vst.msk [vmem:[#allocation1] sm:$0xff] %vm74_vm0, %v71_v29  ;;  %89 = vst.msk [vmem:[#allocation1 + $0x8] sm:$0xff] %vm74_vm0, %v85_v30  ;;  %v127_v36 = vrot.slane %v126_v34, 1 }
   0xd   :  { %103 = vst.msk [vmem:[#allocation1 + $0x10] sm:$0xff] %vm74_vm0, %v99_v31  ;;  %v141_v37 = vrot.slane %v140_v35, 1  ;;  %v154_v38 = vld [vmem:[#allocation0 + $0x6f] ss:$-1 sm:$0xff]  ;;  %v168_v39 = vld [vmem:[#allocation0 + $0x7f] ss:$-1 sm:$0xff] }
   0xe   :  { %117 = vst.msk [vmem:[#allocation1 + $0x18] sm:$0xff] %vm74_vm0, %v113_v33  ;;  %v155_v40 = vrot.slane %v154_v38, 1  ;;  %v169_v41 = vrot.slane %v168_v39, 1  ;;  %131 = vst.msk [vmem:[#allocation1 + $0x20] sm:$0xff] %vm74_vm0, %v127_v36 }
   0xf   :  { %145 = vst.msk [vmem:[#allocation1 + $0x28] sm:$0xff] %vm74_vm0, %v141_v37 }
  0x10   :  { %159 = vst.msk [vmem:[#allocation1 + $0x30] sm:$0xff] %vm74_vm0, %v155_v40  ;;  %173 = vst.msk [vmem:[#allocation1 + $0x38] sm:$0xff] %vm74_vm0, %v169_v41 }
  0x13   :  { %v216_v42 = vld [vmem:[#allocation1] sm:$0xff]  ;;  %v218_v43 = vld [vmem:[#allocation1 + $0x8] sm:$0xff] }
  0x14   :  { %v220_v44 = vld [vmem:[#allocation1 + $0x10] sm:$0xff]  ;;  %217 = vst [vmem:[%s332_s1] sm:$0xff] %v216_v42  ;;  %219 = vst [vmem:[%s332_s1 + $0x8] sm:$0xff] %v218_v43 }
  0x15   :  { %221 = vst [vmem:[%s332_s1 + $0x10] sm:$0xff] %v220_v44  ;;  %v222_v45 = vld [vmem:[#allocation1 + $0x18] sm:$0xff]  ;;  %v224_v46 = vld [vmem:[#allocation1 + $0x20] sm:$0xff] }
  0x16   :  { %223 = vst [vmem:[%s332_s1 + $0x18] sm:$0xff] %v222_v45  ;;  %v226_v47 = vld [vmem:[#allocation1 + $0x28] sm:$0xff]  ;;  %225 = vst [vmem:[%s332_s1 + $0x20] sm:$0xff] %v224_v46 }
  0x17   :  { %227 = vst [vmem:[%s332_s1 + $0x28] sm:$0xff] %v226_v47  ;;  %v228_v48 = vld [vmem:[#allocation1 + $0x30] sm:$0xff]  ;;  %v230_v49 = vld [vmem:[#allocation1 + $0x38] sm:$0xff] }
  0x18   :  { %229 = vst [vmem:[%s332_s1 + $0x30] sm:$0xff] %v228_v48  ;;  %231 = vst [vmem:[%s332_s1 + $0x38] sm:$0xff] %v230_v49 }

// kernel: spectral_conv2d.1
= control target key start
LH: loop header
LB: loop body
LE: loop exit
PB: predicated region body
PF: predicated region fallthrough
CT: control target
= control target key end

     0   :  { %s830_s18 = smov 0   ;;  %s832_s19 = smov 0   ;;  %s913_s0 = inlined_call_operand.vmem [shape: f32[2,2,4,128], index: 0, kind: input, shape index: {}]   ;;  %s914_s1 = inlined_call_operand.vmem [shape: f32[2,2,4,128], index: 1, kind: input, shape index: {}]   ;;  %s915_s2 = inlined_call_operand.vmem [shape: f32[2,4,4,128], index: 2, kind: input, shape index: {}]   ;;  %s916_s3 = inlined_call_operand.vmem [shape: f32[2,4,4,128], index: 3, kind: input, shape index: {}]   ;;  %s917_s4 = inlined_call_operand.vmem [shape: f32[2,2,4,128], index: 4, kind: output, shape index: {0}]   ;;  %s918_s5 = inlined_call_operand.vmem [shape: f32[2,2,4,128], index: 5, kind: output, shape index: {1}]  }
   0x1   :  { %s834_s20 = smov 0  }
   0x2 LB: > { %s28_s21 = sadd.s32 1, %s794_s19  ;;  %p709_p0 = scmp.ge.s32.totalorder %s798_s20, 1  ;;  %s798_s20 = sphi %s834_s20, %s16_s20   ;;  %s794_s19 = sphi %s832_s19, %s920_s19   ;;  %s790_s18 = sphi %s830_s18, %s919_s18  }
   0x3   : > { %p30_p1 = scmp.ge.s32.totalorder %s28_s21, 2  ;;  %p250_p2 = scmp.lt.s32.totalorder %s798_s20, 3 }
   0x5   : > { %s922_s21 = smov (%p30_p1, %s28_s21), 0  ;;  %p251_p3 = pnand %p709_p0, %p250_p2 }
   0x6   : > { %p315_p4 = scmp.lt.s32.totalorder (!%p251_p3), %s790_s18, 1 }
   0x7   : > { %254 = sbr.rel (%p251_p3) target bundleno = 39 (0x27), region = 36 }
   0xc   : > { %s924_s18 = smov (!%p315_p4, %s790_s18), 1 }
   0xd   : > { %s848_s22 = sshll.u32 %s924_s18, 3  ;;  %s748_s23 = sshll.u32 %s924_s18, 4 }
   0xe   : > { %s854_s26 = scalar_lea.vmem %s913_s0, %s848_s22  ;;  %s860_s29 = scalar_lea.vmem %s914_s1, %s848_s22 }
   0xf   : > { %s338_s7 = scalar_lea.vmem %s915_s2, %s748_s23  ;;  %s343_s10 = scalar_lea.vmem %s916_s3, %s748_s23  ;;  %v722_v0 = vld [vmem:[%s854_s26] ss:$0 sm:$0xff]  ;;  %v728_v2 = vld [vmem:[%s854_s26 + $0x1] ss:$0 sm:$0xff]  ;;  %v734_v10 = vld [vmem:[%s854_s26 + $0x2] ss:$0 sm:$0xff] }
  0x10   : > { %v724_v1 = vld [vmem:[%s860_s29] ss:$0 sm:$0xff]  ;;  %v730_v5 = vld [vmem:[%s860_s29 + $0x1] ss:$0 sm:$0xff]  ;;  %v875_v8 = vld [vmem:[%s338_s7 + $0x4] sm:$0xf]  ;;  %s352_s13 = scalar_lea.vmem %s917_s4, %s848_s22  ;;  %s362_s16 = scalar_lea.vmem %s918_s5, %s848_s22 }
  0x11   : > { %v871_v3 = vld [vmem:[%s338_s7] sm:$0xf]  ;;  %v727_v9 = vld [vmem:[%s343_s10 + $0x4] sm:$0xf]  ;;  %v418_v13 = vmul.f32 %v728_v2, %v875_v8  ;;  %v732_v16 = vld [vmem:[%s338_s7 + $0x8] sm:$0xf]  ;;  %v436_v19 = vmul.f32 %v730_v5, %v875_v8 }
  0x12   : > { %v369_v4 = vld [vmem:[%s343_s10] sm:$0xf]  ;;  %v378_v6 = vmul.f32 %v722_v0, %v871_v3  ;;  %v396_v12 = vmul.f32 %v724_v1, %v871_v3  ;;  %v428_v14 = vmul.f32 %v730_v5, %v727_v9  ;;  %v733_v17 = vld [vmem:[%s343_s10 + $0x8] sm:$0xf]  ;;  %v434_v18 = vmul.f32 %v728_v2, %v727_v9  ;;  %v738_v25 = vld [vmem:[%s338_s7 + $0xc] sm:$0xf] }
  0x13   : > { %v388_v7 = vmul.f32 %v724_v1, %v369_v4  ;;  %v394_v11 = vmul.f32 %v722_v0, %v369_v4  ;;  %v736_v15 = vld [vmem:[%s860_s29 + $0x2] ss:$0 sm:$0xff]  ;;  %v458_v21 = vmul.f32 %v734_v10, %v732_v16  ;;  %v740_v23 = vld [vmem:[%s854_s26 + $0x3] ss:$0 sm:$0xff]  ;;  %v739_v28 = vld [vmem:[%s343_s10 + $0xc] sm:$0xf]  ;;  %v474_v33 = vmul.f32 %v734_v10, %v733_v17 }
  0x14   : > { %v468_v22 = vmul.f32 %v736_v15, %v733_v17  ;;  %v742_v24 = vld [vmem:[%s860_s29 + $0x3] ss:$0 sm:$0xff]  ;;  %v430_v27 = vsub.f32 %v418_v13, %v428_v14  ;;  %v498_v29 = vmul.f32 %v740_v23, %v738_v25  ;;  %v723_v30 = vld [vmem:[%s854_s26 + $0x4] ss:$0 sm:$0xff]  ;;  %v438_v32 = vadd.f32 %v436_v19, %v434_v18  ;;  %v729_v38 = vld [vmem:[%s854_s26 + $0x5] ss:$0 sm:$0xff] }
  0x15   : > { %v390_v20 = vsub.f32 %v378_v6, %v388_v7  ;;  %v398_v26 = vadd.f32 %v396_v12, %v394_v11  ;;  %v725_v31 = vld [vmem:[%s860_s29 + $0x4] ss:$0 sm:$0xff]  ;;  %v508_v35 = vmul.f32 %v742_v24, %v739_v28  ;;  %v379_v36 = vmul.f32 %v723_v30, %v871_v3  ;;  %v731_v39 = vld [vmem:[%s860_s29 + $0x5] ss:$0 sm:$0xff]  ;;  %v735_v40 = vld [vmem:[%s854_s26 + $0x6] ss:$0 sm:$0xff] }
  0x16   : > { %v470_v34 = vsub.f32 %v458_v21, %v468_v22  ;;  %v389_v37 = vmul.f32 %v725_v31, %v369_v4  ;;  %v419_v42 = vmul.f32 %v729_v38, %v875_v8  ;;  %v429_v43 = vmul.f32 %v731_v39, %v727_v9  ;;  %v737_v44 = vld [vmem:[%s860_s29 + $0x6] ss:$0 sm:$0xff]  ;;  %v741_v46 = vld [vmem:[%s854_s26 + $0x7] ss:$0 sm:$0xff] }
  0x17   : > { %v432_v41 = vadd.f32 %v430_v27, %v390_v20  ;;  %v459_v45 = vmul.f32 %v735_v40, %v732_v16  ;;  %v743_v47 = vld [vmem:[%s860_s29 + $0x7] ss:$0 sm:$0xff]  ;;  %v510_v48 = vsub.f32 %v498_v29, %v508_v35  ;;  %v469_v50 = vmul.f32 %v737_v44, %v733_v17 }
  0x18   : > { %v391_v49 = vsub.f32 %v379_v36, %v389_v37  ;;  %v499_v51 = vmul.f32 %v741_v46, %v738_v25  ;;  %v431_v53 = vsub.f32 %v419_v42, %v429_v43  ;;  %v509_v54 = vmul.f32 %v743_v47, %v739_v28 }
  0x19   : > { %v472_v52 = vadd.f32 %v470_v34, %v432_v41  ;;  %v440_v55 = vadd.f32 %v438_v32, %v398_v26  ;;  %v471_v56 = vsub.f32 %v459_v45, %v469_v50  ;;  %v476_v57 = vmul.f32 %v736_v15, %v732_v16 }
  0x1a   : > { %v514_v58 = vmul.f32 %v740_v23, %v739_v28  ;;  %v516_v59 = vmul.f32 %v742_v24, %v738_v25  ;;  %v433_v61 = vadd.f32 %v431_v53, %v391_v49  ;;  %v511_v62 = vsub.f32 %v499_v51, %v509_v54 }
  0x1b   : > { %v512_v60 = vadd.f32 %v510_v48, %v472_v52  ;;  %v395_v63 = vmul.f32 %v723_v30, %v369_v4  ;;  %v478_v0 = vadd.f32 %v476_v57, %v474_v33  ;;  %v397_v2 = vmul.f32 %v725_v31, %v871_v3 }
  0x1c   : > { %v518_v1 = vadd.f32 %v516_v59, %v514_v58  ;;  %v435_v5 = vmul.f32 %v729_v38, %v727_v9  ;;  %v473_v6 = vadd.f32 %v471_v56, %v433_v61  ;;  %v437_v7 = vmul.f32 %v731_v39, %v875_v8 }
  0x1d   : > { %522 = vst [vmem:[%s352_s13] sm:$0xf] %v512_v60  ;;  %v475_v10 = vmul.f32 %v735_v40, %v733_v17  ;;  %v477_v11 = vmul.f32 %v737_v44, %v732_v16  ;;  %v480_v12 = vadd.f32 %v478_v0, %v440_v55  ;;  %v399_v13 = vadd.f32 %v397_v2, %v395_v63 }
  0x1e   : > { %v515_v14 = vmul.f32 %v741_v46, %v739_v28  ;;  %v517_v15 = vmul.f32 %v743_v47, %v738_v25  ;;  %v513_v18 = vadd.f32 %v511_v62, %v473_v6  ;;  %v439_v4 = vadd.f32 %v437_v7, %v435_v5 }
  0x1f   : > { %v479_v19 = vadd.f32 %v477_v11, %v475_v10  ;;  %v520_v20 = vadd.f32 %v518_v1, %v480_v12 }
  0x20   : > { %523 = vst [vmem:[%s352_s13 + $0x4] sm:$0xf] %v513_v18  ;;  %v441_v3 = vadd.f32 %v439_v4, %v399_v13  ;;  %v519_v9 = vadd.f32 %v517_v15, %v515_v14 }
  0x21   : > { %524 = vst [vmem:[%s362_s16] sm:$0xf] %v520_v20 }
  0x22   : > { %v481_v21 = vadd.f32 %v479_v19, %v441_v3 }
  0x24   : > { %v521_v8 = vadd.f32 %v519_v9, %v481_v21 }
  0x26   : > { %525 = vst [vmem:[%s362_s16 + $0x4] sm:$0xf] %v521_v8 }
  0x27 PF: > { %s16_s20 = sadd.s32 1, %s798_s20   ;;  %s919_s18 = smov %s794_s19 }
  0x28   : > { %p13_p5 = scmp.ge.s32.totalorder %s16_s20, 4   ;;  %s920_s19 = smov %s922_s21 }
  0x2a   :  { %15 = sbr.rel (!%p13_p5) target bundleno = 2 (0x2), region = 93 }

</bundles_post_ra>
